<compile_context>
chip_gen: v7x
topology: tpu7x:2x2x1
jax: 0.10.0
libtpu: 0.0.40
codegen_flags: <defaults>
</compile_context>

<pallas_src>
import jax
import jax.numpy as jnp
from jax.experimental import pallas as pl
from jax.experimental.pallas import tpu as pltpu


def conv1x1_kernel(w_ref, x_ref, o_ref):
    # w_ref: (C_out, C_in)        e.g. (80, 480)
    # x_ref: (C_in, lane_tile)    e.g. (480, 784) or (480, 512)
    # o_ref: (C_out, lane_tile)   lane-dense output
    o_ref[...] = jnp.dot(
        w_ref[...], x_ref[...], preferred_element_type=jnp.float32
    ).astype(o_ref.dtype)


def _num_tensorcores_per_chip():
    """Best-effort: 2 TCs on v7x-class parts, else 1. Fallback is safe (=1)."""
    try:
        kind = jax.devices()[0].device_kind.lower().replace(" ", "")
    except Exception:
        return 1
    return 2 if ("v7" in kind or "tpu7" in kind) else 1


def conv2d_1x1(x_nchw, weight_oihw, *, compute_dtype=jnp.bfloat16):
    """nn.Conv2d(C_in, C_out, kernel_size=1, stride=1, bias=False) forward.

    x_nchw:      (N, C_in, H, W)
    weight_oihw: (C_out, C_in, 1, 1)
    returns:     (N, C_out, H, W), same dtype as x_nchw.
    """
    N, C_in, H, W = x_nchw.shape
    C_out = weight_oihw.shape[0]
    HW = H * W
    L = N * HW  # lane (minor-most) dimension of X and the output

    # Build X = (C_in, N*H*W). For N == 1 this is a free reshape; for N > 1
    # fold batch into the lane axis (fixes the old shape-invalid reshape).
    if N == 1:
        x_mat = x_nchw.reshape(C_in, L)
    else:
        x_mat = jnp.transpose(x_nchw, (1, 0, 2, 3)).reshape(C_in, L)
    w_mat = weight_oihw.reshape(C_out, C_in)

    out_dtype = x_nchw.dtype
    if compute_dtype is not None:
        x_mat = x_mat.astype(compute_dtype)
        w_mat = w_mat.astype(compute_dtype)

    # Lane tiling: one block on single-TC chips (per-step overhead would
    # dominate this ~1-2 us kernel); split the lane axis across both cores on
    # 2-TC chips, keeping the weight resident (constant index_map).
    if _num_tensorcores_per_chip() >= 2 and L >= 256:
        lane_tile = ((L + 1) // 2 + 127) // 128 * 128  # multiple of 128
        lane_tile = min(lane_tile, L)
        grid = (pl.cdiv(L, lane_tile),)
        semantics = ("parallel",)
    else:
        lane_tile = L
        grid = (1,)
        semantics = ("arbitrary",)

    in_itemsize = jnp.dtype(x_mat.dtype).itemsize
    flops = 2 * C_out * C_in * L
    bytes_accessed = (
        in_itemsize * (C_out * C_in + C_in * L)
        + jnp.dtype(out_dtype).itemsize * C_out * L
    )

    out_mat = pl.pallas_call(
        conv1x1_kernel,
        out_shape=jax.ShapeDtypeStruct((C_out, L), out_dtype),
        grid_spec=pltpu.PrefetchScalarGridSpec(
            num_scalar_prefetch=0,
            grid=grid,
            in_specs=[
                pl.BlockSpec((C_out, C_in), lambda i: (0, 0)),      # weight resident
                pl.BlockSpec((C_in, lane_tile), lambda i: (0, i)),  # X lane tile
            ],
            out_specs=pl.BlockSpec((C_out, lane_tile), lambda i: (0, i)),
        ),
        compiler_params=pltpu.CompilerParams(dimension_semantics=semantics),
        cost_estimate=pl.CostEstimate(
            flops=flops, transcendentals=0, bytes_accessed=bytes_accessed
        ),
    )(w_mat, x_mat)

    # (C_out, N*H*W) -> (N, C_out, H, W)
    if N == 1:
        return out_mat.reshape(1, C_out, H, W)
    return jnp.transpose(out_mat.reshape(C_out, N, H, W), (1, 0, 2, 3))


# TODO(synk): in the full EfficientNet block, fuse the following BN/activation
# (or the neighboring 1x1 conv) into this kernel to amortize pallas_call
# overhead; standalone, this conv is latency/DMA bound.


if __name__ == "__main__":
    key = jax.random.PRNGKey(0)
    k_x, k_w = jax.random.split(key)

    # Shapes implied by the module's forward: x237 = randn([1, 480, 28, 28])
    N, C_in, H, W = 1, 480, 28, 28
    C_out = 80

    x = jax.random.normal(k_x, (N, C_in, H, W), dtype=jnp.float32)
    # Deterministic synthetic conv weight, (C_out, C_in, 1, 1), no bias.
    weight = jax.random.normal(k_w, (C_out, C_in, 1, 1), dtype=jnp.float32) * 0.05

    # Plain-JAX f32 reference.
    y_ref = (weight.reshape(C_out, C_in) @ x.reshape(C_in, H * W)).reshape(
        N, C_out, H, W
    )

    # Default (bf16 inputs, f32 accumulation) path.
    y = conv2d_1x1(x, weight)
    jax.block_until_ready(y)
    assert y.shape == (N, C_out, H, W), y.shape
    assert jnp.allclose(y, y_ref, atol=5e-2, rtol=5e-2), float(
        jnp.max(jnp.abs(y - y_ref))
    )

    # Full-precision path, tight tolerance.
    y_f32 = conv2d_1x1(x, weight, compute_dtype=None)
    jax.block_until_ready(y_f32)
    assert jnp.allclose(y_f32, y_ref, atol=1e-4, rtol=1e-4)

    print("KERNEL_OK")
</pallas_src>

<mosaic_0001>
module attributes {stable_mosaic.version = 11 : i64} {
  func.func @conv1x1_kernel(%arg0: i32, %arg1: memref<80x480xbf16, #tpu.memory_space<vmem>>, %arg2: memref<480x784xbf16, #tpu.memory_space<vmem>>, %arg3: memref<80x784xf32, #tpu.memory_space<vmem>>) attributes {dimension_semantics = [#tpu.dimension_semantics<arbitrary>], iteration_bounds = array<i64: 1>, scalar_prefetch = 0 : i64, scratch_operands = 0 : i64, tpu.core_type = #tpu.core_type<tc>, window_params = [{pipeline_mode = #tpu.pipeline_mode<synchronous>, transform_indices = @transform_0, window_bounds = array<i64: 80, 480>}, {transform_indices = @transform_1, window_bounds = array<i64: 480, 784>}, {transform_indices = @transform_2, window_bounds = array<i64: 80, 784>}]} {
    %c0 = arith.constant 0 : index
    %c0_0 = arith.constant 0 : index
    %0 = vector.load %arg1[%c0, %c0_0] : memref<80x480xbf16, #tpu.memory_space<vmem>>, vector<80x480xbf16>
    %c0_1 = arith.constant 0 : index
    %c0_2 = arith.constant 0 : index
    %1 = vector.load %arg2[%c0_1, %c0_2] : memref<480x784xbf16, #tpu.memory_space<vmem>>, vector<480x784xbf16>
    %cst = arith.constant dense<0.000000e+00> : vector<80x784xf32>
    %2 = tpu.matmul %0, %1, %cst {dimension_numbers = #tpu.dot_dimension_numbers<[1], [0], [0], [1], [0, 0, 1, 1], [], []>} : vector<80x480xbf16>, vector<480x784xbf16>, vector<80x784xf32> -> vector<80x784xf32>
    %c0_3 = arith.constant 0 : index
    %c0_4 = arith.constant 0 : index
    %3 = vector.load %arg3[%c0_3, %c0_4] : memref<80x784xf32, #tpu.memory_space<vmem>>, vector<80x784xf32>
    tpu.vector_store %arg3[%c0_3, %c0_4], %2 {strides = array<i32>} : memref<80x784xf32, #tpu.memory_space<vmem>>, vector<80x784xf32>,
    return
  }
  func.func @transform_0(%arg0: i32) -> (i32, i32) {
    %c0_i32 = arith.constant 0 : i32
    %c0_i32_0 = arith.constant 0 : i32
    %c0_i32_1 = arith.constant 0 : i32
    return %c0_i32, %c0_i32_0 : i32, i32
  }
  func.func @transform_1(%arg0: i32) -> (i32, i32) {
    %c0_i32 = arith.constant 0 : i32
    %c0_i32_0 = arith.constant 0 : i32
    return %c0_i32, %arg0 : i32, i32
  }
  func.func @transform_2(%arg0: i32) -> (i32, i32) {
    %c0_i32 = arith.constant 0 : i32
    %c0_i32_0 = arith.constant 0 : i32
    return %c0_i32, %arg0 : i32, i32
  }
}

</mosaic_0001>

<bundles_post_ra>
// kernel: tpu_custom_call.1
= control target key start
LH: loop header
LB: loop body
LE: loop exit
PB: predicated region body
PF: predicated region fallthrough
CT: control target
= control target key end

     0   :  { %vm1448_vm0 = vcmask 785408   ;;  %s3794_s0 = inlined_call_operand.vmem [shape: bf16[80,480], index: 0, kind: input, shape index: {}]   ;;  %s3795_s1 = inlined_call_operand.vmem [shape: bf16[480,784], index: 1, kind: input, shape index: {}]   ;;  %s3796_s2 = inlined_call_operand.hbm [shape: f32[80,784], index: 2, kind: output, shape index: {}]  }
   0x1   :  { %v2555_v0 = vld [vmem:[%s3795_s1 + $0x4] ss:$28 sps:$4 sm:$0xff]   ;;  %v2557_v1 = vld [vmem:[%s3795_s1 + $0xc] ss:$28 sps:$4 sm:$0xff]   ;;  %v2561_v4 = vld [vmem:[%s3795_s1 + $0x3c] ss:$28 sps:$4 sm:$0xff]  }
   0x2   :  { %1464 = vmatprep.subr.bf16.mxu0 %v2555_v0  ;;  %v2559_v2 = vld [vmem:[%s3795_s1] ss:$28 sps:$4 sm:$0xff]   ;;  %v2560_v3 = vld [vmem:[%s3795_s1 + $0x8] ss:$28 sps:$4 sm:$0xff]   ;;  %1630 = vmatprep.subr.bf16.mxu1 %v2557_v1  ;;  %v2565_v6 = vld [vmem:[%s3795_s1 + $0x38] ss:$28 sps:$4 sm:$0xff]  }
   0x3   :  { %1465 = vmatpush1.bf16.msra.mxu0 %v2559_v2  ;;  %1631 = vmatpush1.bf16.msra.mxu1 %v2560_v3  ;;  %v2563_v5 = vld [vmem:[%s3795_s1 + $0x44] ss:$28 sps:$4 sm:$0xff]   ;;  %v2567_v8 = vld [vmem:[%s3795_s1 + $0x74] ss:$28 sps:$4 sm:$0xff]   ;;  %v2569_v9 = vld [vmem:[%s3795_s1 + $0x7c] ss:$28 sps:$4 sm:$0xff]  }
   0x4   :  { %1466 = vmatprep.subr.bf16.mxu0 %v2561_v4  ;;  %v2566_v7 = vld [vmem:[%s3795_s1 + $0x40] ss:$28 sps:$4 sm:$0xff]   ;;  %1632 = vmatprep.subr.bf16.mxu1 %v2563_v5  ;;  %v2571_v10 = vld [vmem:[%s3795_s1 + $0x70] ss:$28 sps:$4 sm:$0xff]   ;;  %v2572_v11 = vld [vmem:[%s3795_s1 + $0x78] ss:$28 sps:$4 sm:$0xff]  }
   0x5   :  { %v2573_v12 = vld [vmem:[%s3795_s1 + $0xac] ss:$28 sps:$4 sm:$0xff]   ;;  %v2575_v13 = vld [vmem:[%s3795_s1 + $0xb4] ss:$28 sps:$4 sm:$0xff]   ;;  %v2579_v16 = vld [vmem:[%s3795_s1 + $0xe4] ss:$28 sps:$4 sm:$0xff]  }
   0x6   :  { %v2577_v14 = vld [vmem:[%s3795_s1 + $0xa8] ss:$28 sps:$4 sm:$0xff]   ;;  %v2578_v15 = vld [vmem:[%s3795_s1 + $0xb0] ss:$28 sps:$4 sm:$0xff]   ;;  %v2583_v18 = vld [vmem:[%s3795_s1 + $0xe0] ss:$28 sps:$4 sm:$0xff]  }
   0x7   :  { %1467 = vmatpush1.bf16.msra.mxu0 %v2565_v6  ;;  %1633 = vmatpush1.bf16.msra.mxu1 %v2566_v7  ;;  %v2581_v17 = vld [vmem:[%s3795_s1 + $0xec] ss:$28 sps:$4 sm:$0xff]   ;;  %v2585_v20 = vld [vmem:[%s3795_s1 + $0x11c] ss:$28 sps:$4 sm:$0xff]   ;;  %v2587_v21 = vld [vmem:[%s3795_s1 + $0x124] ss:$28 sps:$4 sm:$0xff]  }
   0x8   :  { %1468 = vmatprep.subr.bf16.mxu0 %v2567_v8  ;;  %1634 = vmatprep.subr.bf16.mxu1 %v2569_v9  ;;  %v2584_v19 = vld [vmem:[%s3795_s1 + $0xe8] ss:$28 sps:$4 sm:$0xff]   ;;  %v2589_v22 = vld [vmem:[%s3795_s1 + $0x118] ss:$28 sps:$4 sm:$0xff]   ;;  %v2590_v23 = vld [vmem:[%s3795_s1 + $0x120] ss:$28 sps:$4 sm:$0xff]  }
   0x9   :  { %v2591_v24 = vld [vmem:[%s3795_s1 + $0x154] ss:$28 sps:$4 sm:$0xff]   ;;  %v2593_v25 = vld [vmem:[%s3795_s1 + $0x15c] ss:$28 sps:$4 sm:$0xff]   ;;  %v2597_v28 = vld [vmem:[%s3795_s1 + $0x18c] ss:$28 sps:$4 sm:$0xff]  }
   0xa   :  { %v2595_v26 = vld [vmem:[%s3795_s1 + $0x150] ss:$28 sps:$4 sm:$0xff]   ;;  %v2596_v27 = vld [vmem:[%s3795_s1 + $0x158] ss:$28 sps:$4 sm:$0xff]   ;;  %v2601_v30 = vld [vmem:[%s3795_s1 + $0x188] ss:$28 sps:$4 sm:$0xff]  }
   0xb   :  { %1469 = vmatpush1.bf16.msra.mxu0 %v2571_v10  ;;  %1635 = vmatpush1.bf16.msra.mxu1 %v2572_v11  ;;  %v2599_v29 = vld [vmem:[%s3795_s1 + $0x194] ss:$28 sps:$4 sm:$0xff]   ;;  %v2603_v32 = vld [vmem:[%s3795_s1 + $0x1c4] ss:$28 sps:$4 sm:$0xff]   ;;  %v2605_v33 = vld [vmem:[%s3795_s1 + $0x1cc] ss:$28 sps:$4 sm:$0xff]  }
   0xc   :  { %1470 = vmatprep.subr.bf16.mxu0 %v2573_v12  ;;  %1636 = vmatprep.subr.bf16.mxu1 %v2575_v13  ;;  %v2602_v31 = vld [vmem:[%s3795_s1 + $0x190] ss:$28 sps:$4 sm:$0xff]   ;;  %v2607_v34 = vld [vmem:[%s3795_s1 + $0x1c0] ss:$28 sps:$4 sm:$0xff]   ;;  %v2608_v35 = vld [vmem:[%s3795_s1 + $0x1c8] ss:$28 sps:$4 sm:$0xff]  }
   0xd   :  { %v2609_v36 = vld [vmem:[%s3795_s1 + $0x1fc] ss:$28 sps:$4 sm:$0xff]   ;;  %v2611_v37 = vld [vmem:[%s3795_s1 + $0x204] ss:$28 sps:$4 sm:$0xff]   ;;  %v2615_v40 = vld [vmem:[%s3795_s1 + $0x234] ss:$28 sps:$4 sm:$0xff]  }
   0xe   :  { %v2613_v38 = vld [vmem:[%s3795_s1 + $0x1f8] ss:$28 sps:$4 sm:$0xff]   ;;  %v2614_v39 = vld [vmem:[%s3795_s1 + $0x200] ss:$28 sps:$4 sm:$0xff]   ;;  %v2619_v42 = vld [vmem:[%s3795_s1 + $0x230] ss:$28 sps:$4 sm:$0xff]  }
   0xf   :  { %1471 = vmatpush1.bf16.msra.mxu0 %v2577_v14  ;;  %1637 = vmatpush1.bf16.msra.mxu1 %v2578_v15  ;;  %v2617_v41 = vld [vmem:[%s3795_s1 + $0x23c] ss:$28 sps:$4 sm:$0xff]   ;;  %v2621_v44 = vld [vmem:[%s3795_s1 + $0x26c] ss:$28 sps:$4 sm:$0xff]   ;;  %v2623_v45 = vld [vmem:[%s3795_s1 + $0x274] ss:$28 sps:$4 sm:$0xff]  }
  0x10   :  { %1472 = vmatprep.subr.bf16.mxu0 %v2579_v16  ;;  %1638 = vmatprep.subr.bf16.mxu1 %v2581_v17  ;;  %v2620_v43 = vld [vmem:[%s3795_s1 + $0x238] ss:$28 sps:$4 sm:$0xff]   ;;  %v2625_v46 = vld [vmem:[%s3795_s1 + $0x268] ss:$28 sps:$4 sm:$0xff]   ;;  %v2626_v48 = vld [vmem:[%s3795_s1 + $0x270] ss:$28 sps:$4 sm:$0xff]  }
  0x11   :  { %v3072_v47 = vld [vmem:[%s3794_s0 + $0x4] ss:$16 sps:$4 sm:$0xff]   ;;  %v2629_v50 = vld [vmem:[%s3795_s1 + $0x2ac] ss:$28 sps:$4 sm:$0xff]   ;;  %v2631_v51 = vld [vmem:[%s3795_s1 + $0x2a0] ss:$28 sps:$4 sm:$0xff]  }
  0x12   :  { %v2627_v49 = vld [vmem:[%s3795_s1 + $0x2a4] ss:$28 sps:$4 sm:$0xff]   ;;  %1496 = vmatprep.mubr.bf16.mxu0 %v3072_v47  ;;  %1662 = vmatprep.mubr.bf16.mxu1 %v3072_v47  ;;  %v2633_v53 = vld [vmem:[%s3795_s1 + $0x2dc] ss:$28 sps:$4 sm:$0xff]   ;;  %v2639_v57 = vld [vmem:[%s3795_s1 + $0x314] ss:$28 sps:$4 sm:$0xff]  }
  0x13   :  { %1473 = vmatpush1.bf16.msra.mxu0 %v2583_v18  ;;  %1639 = vmatpush1.bf16.msra.mxu1 %v2584_v19  ;;  %v2632_v52 = vld [vmem:[%s3795_s1 + $0x2a8] ss:$28 sps:$4 sm:$0xff]   ;;  %v2637_v55 = vld [vmem:[%s3795_s1 + $0x2d8] ss:$28 sps:$4 sm:$0xff]   ;;  %v2638_v56 = vld [vmem:[%s3795_s1 + $0x2e0] ss:$28 sps:$4 sm:$0xff]  }
  0x14   :  { %1474 = vmatprep.subr.bf16.mxu0 %v2585_v20  ;;  %1640 = vmatprep.subr.bf16.mxu1 %v2587_v21  ;;  %v2635_v54 = vld [vmem:[%s3795_s1 + $0x2e4] ss:$28 sps:$4 sm:$0xff]   ;;  %v2641_v58 = vld [vmem:[%s3795_s1 + $0x31c] ss:$28 sps:$4 sm:$0xff]   ;;  %v2643_v59 = vld [vmem:[%s3795_s1 + $0x310] ss:$28 sps:$4 sm:$0xff]  }
  0x15   :  { %v2644_v60 = vld [vmem:[%s3795_s1 + $0x318] ss:$28 sps:$4 sm:$0xff]   ;;  %v2645_v61 = vld [vmem:[%s3795_s1 + $0x34c] ss:$28 sps:$4 sm:$0xff]   ;;  %v2655_v1 = vld [vmem:[%s3795_s1 + $0x384] ss:$28 sps:$4 sm:$0xff]  }
  0x16   :  { %v2647_v62 = vld [vmem:[%s3795_s1 + $0x354] ss:$28 sps:$4 sm:$0xff]   ;;  %v2649_v63 = vld [vmem:[%s3795_s1 + $0x348] ss:$28 sps:$4 sm:$0xff]   ;;  %v2653_v3 = vld [vmem:[%s3795_s1 + $0x380] ss:$28 sps:$4 sm:$0xff]  }
  0x17   :  { %1475 = vmatpush1.bf16.msra.mxu0 %v2589_v22  ;;  %1641 = vmatpush1.bf16.msra.mxu1 %v2590_v23  ;;  %v2650_v0 = vld [vmem:[%s3795_s1 + $0x350] ss:$28 sps:$4 sm:$0xff]   ;;  %v2656_v4 = vld [vmem:[%s3795_s1 + $0x388] ss:$28 sps:$4 sm:$0xff]   ;;  %v2662_v6 = vld [vmem:[%s3795_s1 + $0x3bc] ss:$28 sps:$4 sm:$0xff]  }
  0x18   :  { %1476 = vmatprep.subr.bf16.mxu0 %v2591_v24  ;;  %1642 = vmatprep.subr.bf16.mxu1 %v2593_v25  ;;  %v2658_v2 = vld [vmem:[%s3795_s1 + $0x38c] ss:$28 sps:$4 sm:$0xff]   ;;  %v3142_v5 = vld [vmem:[%s3794_s0] ss:$16 sps:$4 sm:$0xff]   ;;  %v3153_v8 = vld [vmem:[%s3794_s0 + $0x24] ss:$16 sps:$4 sm:$0xff]  }
  0x19   :  { %v2665_v7 = vld [vmem:[%s3795_s1 + $0x3c4] ss:$28 sps:$4 sm:$0xff]   ;;  %v2660_v9 = vld [vmem:[%s3795_s1 + $0x3b8] ss:$28 sps:$4 sm:$0xff]   ;;  %v2666_v13 = vld [vmem:[%s3795_s1 + $0x3f0] ss:$28 sps:$4 sm:$0xff]  }
  0x1a   :  { %v2663_v10 = vld [vmem:[%s3795_s1 + $0x3c0] ss:$28 sps:$4 sm:$0xff]   ;;  %v2668_v11 = vld [vmem:[%s3795_s1 + $0x3f4] ss:$28 sps:$4 sm:$0xff]   ;;  %v2674_v16 = vld [vmem:[%s3795_s1 + $0x42c] ss:$28 sps:$4 sm:$0xff]  }
  0x1b   :  { %1477 = vmatpush1.bf16.msra.mxu0 %v2595_v26  ;;  %1643 = vmatpush1.bf16.msra.mxu1 %v2596_v27  ;;  %v2671_v12 = vld [vmem:[%s3795_s1 + $0x3fc] ss:$28 sps:$4 sm:$0xff]   ;;  %v3180_v15 = vld [vmem:[%s3794_s0 + $0x20] ss:$16 sps:$4 sm:$0xff]   ;;  %v3191_v18 = vld [vmem:[%s3794_s0 + $0x44] ss:$16 sps:$4 sm:$0xff]  }
  0x1c   :  { %1478 = vmatprep.subr.bf16.mxu0 %v2597_v28  ;;  %1644 = vmatprep.subr.bf16.mxu1 %v2599_v29  ;;  %v2669_v14 = vld [vmem:[%s3795_s1 + $0x3f8] ss:$28 sps:$4 sm:$0xff]   ;;  %v2672_v19 = vld [vmem:[%s3795_s1 + $0x428] ss:$28 sps:$4 sm:$0xff]   ;;  %v2675_v20 = vld [vmem:[%s3795_s1 + $0x430] ss:$28 sps:$4 sm:$0xff]  }
  0x1d   :  { %v2677_v17 = vld [vmem:[%s3795_s1 + $0x434] ss:$28 sps:$4 sm:$0xff]   ;;  %v2680_v21 = vld [vmem:[%s3795_s1 + $0x464] ss:$28 sps:$4 sm:$0xff]   ;;  %v2683_v22 = vld [vmem:[%s3795_s1 + $0x46c] ss:$28 sps:$4 sm:$0xff]  }
  0x1e   :  { %v2678_v23 = vld [vmem:[%s3795_s1 + $0x460] ss:$28 sps:$4 sm:$0xff]   ;;  %v2681_v24 = vld [vmem:[%s3795_s1 + $0x468] ss:$28 sps:$4 sm:$0xff]   ;;  %v2684_v29 = vld [vmem:[%s3795_s1 + $0x498] ss:$28 sps:$4 sm:$0xff]  }
  0x1f   :  { %1479 = vmatpush1.bf16.msra.mxu0 %v2601_v30  ;;  %1645 = vmatpush1.bf16.msra.mxu1 %v2602_v31  ;;  %v3218_v25 = vld [vmem:[%s3794_s0 + $0x40] ss:$16 sps:$4 sm:$0xff]   ;;  %v2686_v26 = vld [vmem:[%s3795_s1 + $0x49c] ss:$28 sps:$4 sm:$0xff]   ;;  %v3229_v28 = vld [vmem:[%s3794_s0 + $0x64] ss:$16 sps:$4 sm:$0xff]  }
  0x20   :  { %1480 = vmatprep.subr.bf16.mxu0 %v2603_v32  ;;  %1646 = vmatprep.subr.bf16.mxu1 %v2605_v33  ;;  %v2689_v27 = vld [vmem:[%s3795_s1 + $0x4a4] ss:$28 sps:$4 sm:$0xff]   ;;  %v2695_v31 = vld [vmem:[%s3795_s1 + $0x4d4] ss:$28 sps:$4 sm:$0xff]   ;;  %v2698_v32 = vld [vmem:[%s3795_s1 + $0x4dc] ss:$28 sps:$4 sm:$0xff]  }
  0x21   :  { %v2687_v30 = vld [vmem:[%s3795_s1 + $0x4a0] ss:$28 sps:$4 sm:$0xff]   ;;  %v2693_v33 = vld [vmem:[%s3795_s1 + $0x4d0] ss:$28 sps:$4 sm:$0xff]  }
  0x23   :  { %1481 = vmatpush1.bf16.msra.mxu0 %v2607_v34  ;;  %1647 = vmatpush1.bf16.msra.mxu1 %v2608_v35  ;;  %v2696_v34 = vld [vmem:[%s3795_s1 + $0x4d8] ss:$28 sps:$4 sm:$0xff]   ;;  %v3256_v35 = vld [vmem:[%s3794_s0 + $0x60] ss:$16 sps:$4 sm:$0xff]  }
  0x24   :  { %1482 = vmatprep.subr.bf16.mxu0 %v2609_v36  ;;  %1648 = vmatprep.subr.bf16.mxu1 %v2611_v37  ;;  %v2701_v36 = vld [vmem:[%s3795_s1 + $0x50c] ss:$28 sps:$4 sm:$0xff]   ;;  %v2704_v37 = vld [vmem:[%s3795_s1 + $0x514] ss:$28 sps:$4 sm:$0xff]  }
  0x27   :  { %1483 = vmatpush1.bf16.msra.mxu0 %v2613_v38  ;;  %1649 = vmatpush1.bf16.msra.mxu1 %v2614_v39  ;;  %v3267_v38 = vld [vmem:[%s3794_s0 + $0x84] ss:$16 sps:$4 sm:$0xff]  }
  0x28   :  { %1484 = vmatprep.subr.bf16.mxu0 %v2615_v40  ;;  %1650 = vmatprep.subr.bf16.mxu1 %v2617_v41  ;;  %v2699_v39 = vld [vmem:[%s3795_s1 + $0x508] ss:$28 sps:$4 sm:$0xff]   ;;  %v2702_v40 = vld [vmem:[%s3795_s1 + $0x510] ss:$28 sps:$4 sm:$0xff]  }
  0x29   :  { %v2710_v41 = vld [vmem:[%s3795_s1 + $0x544] ss:$28 sps:$4 sm:$0xff]  }
  0x2b   :  { %1485 = vmatpush1.bf16.msra.mxu0 %v2619_v42  ;;  %1651 = vmatpush1.bf16.msra.mxu1 %v2620_v43  ;;  %v2713_v42 = vld [vmem:[%s3795_s1 + $0x54c] ss:$28 sps:$4 sm:$0xff]   ;;  %v2708_v43 = vld [vmem:[%s3795_s1 + $0x540] ss:$28 sps:$4 sm:$0xff]  }
  0x2c   :  { %1486 = vmatprep.subr.bf16.mxu0 %v2621_v44  ;;  %1652 = vmatprep.subr.bf16.mxu1 %v2623_v45  ;;  %v3291_v44 = vld [vmem:[%s3794_s0 + $0x80] ss:$16 sps:$4 sm:$0xff]   ;;  %v2711_v45 = vld [vmem:[%s3795_s1 + $0x548] ss:$28 sps:$4 sm:$0xff]  }
  0x2f   :  { %1487 = vmatpush1.bf16.msra.mxu0 %v2625_v46  ;;  %1653 = vmatpush1.bf16.msra.mxu1 %v2626_v48  ;;  %v2716_v46 = vld [vmem:[%s3795_s1 + $0x57c] ss:$28 sps:$4 sm:$0xff]   ;;  %v2719_v48 = vld [vmem:[%s3795_s1 + $0x584] ss:$28 sps:$4 sm:$0xff]  }
  0x30   :  { %1488 = vmatprep.subr.bf16.mxu0 %v2627_v49  ;;  %1654 = vmatprep.subr.bf16.mxu1 %v2629_v50  ;;  %v3305_v49 = vld [vmem:[%s3794_s0 + $0xc] ss:$16 sps:$4 sm:$0xff]   ;;  %v2714_v50 = vld [vmem:[%s3795_s1 + $0x578] ss:$28 sps:$4 sm:$0xff]  }
  0x33   :  { %1489 = vmatpush1.bf16.msra.mxu0 %v2631_v51  ;;  %1655 = vmatpush1.bf16.msra.mxu1 %v2632_v52  ;;  %v2717_v51 = vld [vmem:[%s3795_s1 + $0x580] ss:$28 sps:$4 sm:$0xff]   ;;  %v2725_v52 = vld [vmem:[%s3795_s1 + $0x5b4] ss:$28 sps:$4 sm:$0xff]  }
  0x34   :  { %1490 = vmatprep.subr.bf16.mxu0 %v2633_v53  ;;  %1656 = vmatprep.subr.bf16.mxu1 %v2635_v54  ;;  %v2728_v53 = vld [vmem:[%s3795_s1 + $0x5bc] ss:$28 sps:$4 sm:$0xff]   ;;  %v2723_v54 = vld [vmem:[%s3795_s1 + $0x5b0] ss:$28 sps:$4 sm:$0xff]  }
  0x37   :  { %1491 = vmatpush1.bf16.msra.mxu0 %v2637_v55  ;;  %1657 = vmatpush1.bf16.msra.mxu1 %v2638_v56  ;;  %v2726_v55 = vld [vmem:[%s3795_s1 + $0x5b8] ss:$28 sps:$4 sm:$0xff]   ;;  %v2731_v56 = vld [vmem:[%s3795_s1 + $0x5ec] ss:$28 sps:$4 sm:$0xff]  }
  0x38   :  { %1492 = vmatprep.subr.bf16.mxu0 %v2639_v57  ;;  %1658 = vmatprep.subr.bf16.mxu1 %v2641_v58  ;;  %v2734_v57 = vld [vmem:[%s3795_s1 + $0x5f4] ss:$28 sps:$4 sm:$0xff]   ;;  %v2729_v58 = vld [vmem:[%s3795_s1 + $0x5e8] ss:$28 sps:$4 sm:$0xff]  }
  0x3b   :  { %1493 = vmatpush1.bf16.msra.mxu0 %v2643_v59  ;;  %1659 = vmatpush1.bf16.msra.mxu1 %v2644_v60  ;;  %v2732_v59 = vld [vmem:[%s3795_s1 + $0x5f0] ss:$28 sps:$4 sm:$0xff]   ;;  %v2740_v60 = vld [vmem:[%s3795_s1 + $0x624] ss:$28 sps:$4 sm:$0xff]  }
  0x3c   :  { %1494 = vmatprep.subr.bf16.mxu0 %v2645_v61  ;;  %1660 = vmatprep.subr.bf16.mxu1 %v2647_v62  ;;  %v2743_v61 = vld [vmem:[%s3795_s1 + $0x62c] ss:$28 sps:$4 sm:$0xff]   ;;  %v2738_v62 = vld [vmem:[%s3795_s1 + $0x620] ss:$28 sps:$4 sm:$0xff]  }
  0x3f   :  { %1495 = vmatpush1.bf16.msra.mxu0 %v2649_v63  ;;  %1661 = vmatpush1.bf16.msra.mxu1 %v2650_v0  ;;  %v2741_v63 = vld [vmem:[%s3795_s1 + $0x628] ss:$28 sps:$4 sm:$0xff]   ;;  %v2746_v0 = vld [vmem:[%s3795_s1 + $0x65c] ss:$28 sps:$4 sm:$0xff]  }
  0x40   :  { %1547 = vmatprep.subr.bf16.mxu0 %v2655_v1  ;;  %1713 = vmatprep.subr.bf16.mxu1 %v2658_v2  ;;  %v2749_v1 = vld [vmem:[%s3795_s1 + $0x664] ss:$28 sps:$4 sm:$0xff]   ;;  %v2744_v2 = vld [vmem:[%s3795_s1 + $0x658] ss:$28 sps:$4 sm:$0xff]  }
  0x42   :  { %1497 = vmatmul.mubr.bf16.vlgmr.msra.gmra.mrb[0].mxu0 %v3142_v5  ;;  %1663 = vmatmul.mubr.bf16.vlgmr.msra.gmra.mrb[0].mxu1 %v3142_v5 }
  0x43   :  { %1548 = vmatpush1.bf16.msra.mxu0 %v2653_v3  ;;  %1714 = vmatpush1.bf16.msra.mxu1 %v2656_v4  ;;  %v2747_v3 = vld [vmem:[%s3795_s1 + $0x660] ss:$28 sps:$4 sm:$0xff]   ;;  %v2755_v4 = vld [vmem:[%s3795_s1 + $0x14] ss:$28 sps:$4 sm:$0xff]  }
  0x44   :  { %1549 = vmatprep.subr.bf16.mxu0 %v2662_v6  ;;  %1715 = vmatprep.subr.bf16.mxu1 %v2665_v7  ;;  %v2761_v6 = vld [vmem:[%s3795_s1 + $0x1d8] ss:$28 sps:$4 sm:$0xff]  }
  0x45   :  { %1506 = vmatprep.mubr.bf16.mxu0 %v3153_v8  ;;  %1672 = vmatprep.mubr.bf16.mxu1 %v3153_v8  ;;  %v3376_v7 = vld [vmem:[%s3794_s0 + $0x8] ss:$16 sps:$4 sm:$0xff]  }
  0x47   :  { %1550 = vmatpush1.bf16.msra.mxu0 %v2660_v9  ;;  %1716 = vmatpush1.bf16.msra.mxu1 %v2663_v10  ;;  %v2753_v9 = vld [vmem:[%s3795_s1 + $0x10] ss:$28 sps:$4 sm:$0xff]  }
  0x48   :  { %1551 = vmatprep.subr.bf16.mxu0 %v2668_v11  ;;  %1717 = vmatprep.subr.bf16.mxu1 %v2671_v12  ;;  %v3384_v10 = vld [vmem:[%s3794_s0 + $0x2c] ss:$16 sps:$4 sm:$0xff]   ;;  %v2766_v12 = vld [vmem:[%s3795_s1 + $0x18] ss:$28 sps:$4 sm:$0xff]  }
  0x49   :  { %v2758_v11 = vld [vmem:[%s3795_s1 + $0x4c] ss:$28 sps:$4 sm:$0xff]  }
  0x4a   :  { %1507 = vmatmul.mubr.bf16.gmra.mrb[4].mxu0 %v3180_v15  ;;  %1673 = vmatmul.mubr.bf16.gmra.mrb[4].mxu1 %v3180_v15 }
  0x4b   :  { %1552 = vmatpush1.bf16.msra.mxu0 %v2666_v13  ;;  %1718 = vmatpush1.bf16.msra.mxu1 %v2669_v14  ;;  %v2767_v13 = vld [vmem:[%s3795_s1 + $0x210] ss:$28 sps:$4 sm:$0xff]   ;;  %v2756_v14 = vld [vmem:[%s3795_s1 + $0x48] ss:$28 sps:$4 sm:$0xff]  }
  0x4c   :  { %1553 = vmatprep.subr.bf16.mxu0 %v2674_v16  ;;  %1719 = vmatprep.subr.bf16.mxu1 %v2677_v17  ;;  %v2765_v16 = vld [vmem:[%s3795_s1 + $0x84] ss:$28 sps:$4 sm:$0xff]   ;;  %v2771_v17 = vld [vmem:[%s3795_s1 + $0x50] ss:$28 sps:$4 sm:$0xff]  }
  0x4d   :  { %1516 = vmatprep.mubr.bf16.mxu0 %v3191_v18  ;;  %1682 = vmatprep.mubr.bf16.mxu1 %v3191_v18 }
  0x4f   :  { %1554 = vmatpush1.bf16.msra.mxu0 %v2672_v19  ;;  %1720 = vmatpush1.bf16.msra.mxu1 %v2675_v20  ;;  %v3413_v19 = vld [vmem:[%s3794_s0 + $0x28] ss:$16 sps:$4 sm:$0xff]   ;;  %v2763_v20 = vld [vmem:[%s3795_s1 + $0x80] ss:$28 sps:$4 sm:$0xff]  }
  0x50   :  { %1555 = vmatprep.subr.bf16.mxu0 %v2680_v21  ;;  %1721 = vmatprep.subr.bf16.mxu1 %v2683_v22  ;;  %v3421_v21 = vld [vmem:[%s3794_s0 + $0x4c] ss:$16 sps:$4 sm:$0xff]  }
  0x51   :  { %v2770_v22 = vld [vmem:[%s3795_s1 + $0xbc] ss:$28 sps:$4 sm:$0xff]  }
  0x52   :  { %1517 = vmatmul.mubr.bf16.gmra.mrb[8].mxu0 %v3218_v25  ;;  %1683 = vmatmul.mubr.bf16.gmra.mrb[8].mxu1 %v3218_v25 }
  0x53   :  { %1556 = vmatpush1.bf16.msra.mxu0 %v2678_v23  ;;  %1722 = vmatpush1.bf16.msra.mxu1 %v2681_v24  ;;  %v2768_v23 = vld [vmem:[%s3795_s1 + $0xb8] ss:$28 sps:$4 sm:$0xff]   ;;  %v2774_v24 = vld [vmem:[%s3795_s1 + $0x248] ss:$28 sps:$4 sm:$0xff]  }
  0x54   :  { %1557 = vmatprep.subr.bf16.mxu0 %v2686_v26  ;;  %1723 = vmatprep.subr.bf16.mxu1 %v2689_v27  ;;  %v2779_v26 = vld [vmem:[%s3795_s1 + $0x88] ss:$28 sps:$4 sm:$0xff]   ;;  %v2780_v27 = vld [vmem:[%s3795_s1 + $0x280] ss:$28 sps:$4 sm:$0xff]  }
  0x55   :  { %1526 = vmatprep.mubr.bf16.mxu0 %v3229_v28  ;;  %1692 = vmatprep.mubr.bf16.mxu1 %v3229_v28 }
  0x57   :  { %1558 = vmatpush1.bf16.msra.mxu0 %v2684_v29  ;;  %1724 = vmatpush1.bf16.msra.mxu1 %v2687_v30  ;;  %v2778_v29 = vld [vmem:[%s3795_s1 + $0xf4] ss:$28 sps:$4 sm:$0xff]   ;;  %v3450_v30 = vld [vmem:[%s3794_s0 + $0x48] ss:$16 sps:$4 sm:$0xff]  }
  0x58   :  { %1559 = vmatprep.subr.bf16.mxu0 %v2695_v31  ;;  %1725 = vmatprep.subr.bf16.mxu1 %v2698_v32  ;;  %v2776_v31 = vld [vmem:[%s3795_s1 + $0xf0] ss:$28 sps:$4 sm:$0xff]   ;;  %v2784_v32 = vld [vmem:[%s3795_s1 + $0xc0] ss:$28 sps:$4 sm:$0xff]  }
  0x5a   :  { %1527 = vmatmul.mubr.bf16.gmra.mrb[12].mxu0 %v3256_v35  ;;  %1693 = vmatmul.mubr.bf16.gmra.mrb[12].mxu1 %v3256_v35 }
  0x5b   :  { %1560 = vmatpush1.bf16.msra.mxu0 %v2693_v33  ;;  %1726 = vmatpush1.bf16.msra.mxu1 %v2696_v34  ;;  %v2783_v33 = vld [vmem:[%s3795_s1 + $0x12c] ss:$28 sps:$4 sm:$0xff]  }
  0x5c   :  { %1561 = vmatprep.subr.bf16.mxu0 %v2701_v36  ;;  %1727 = vmatprep.subr.bf16.mxu1 %v2704_v37  ;;  %v3464_v34 = vld [vmem:[%s3794_s0 + $0x6c] ss:$16 sps:$4 sm:$0xff]   ;;  %v2781_v36 = vld [vmem:[%s3795_s1 + $0x128] ss:$28 sps:$4 sm:$0xff]   ;;  %v2787_v37 = vld [vmem:[%s3795_s1 + $0x2b8] ss:$28 sps:$4 sm:$0xff]  }
  0x5d   :  { %1536 = vmatprep.mubr.bf16.mxu0 %v3267_v38  ;;  %1702 = vmatprep.mubr.bf16.mxu1 %v3267_v38 }
  0x5f   :  { %1562 = vmatpush1.bf16.msra.mxu0 %v2699_v39  ;;  %1728 = vmatpush1.bf16.msra.mxu1 %v2702_v40  ;;  %v2791_v39 = vld [vmem:[%s3795_s1 + $0x164] ss:$28 sps:$4 sm:$0xff]   ;;  %v2792_v40 = vld [vmem:[%s3795_s1 + $0xf8] ss:$28 sps:$4 sm:$0xff]  }
  0x60   :  { %1563 = vmatprep.subr.bf16.mxu0 %v2710_v41  ;;  %1729 = vmatprep.subr.bf16.mxu1 %v2713_v42  ;;  %v2793_v41 = vld [vmem:[%s3795_s1 + $0x2f0] ss:$28 sps:$4 sm:$0xff]   ;;  %v3490_v42 = vld [vmem:[%s3794_s0 + $0x68] ss:$16 sps:$4 sm:$0xff]  }
  0x62   :  { %1537 = vmatmul.mubr.bf16.gmra.mrb[16].mxu0 %v3291_v44  ;;  %1703 = vmatmul.mubr.bf16.gmra.mrb[16].mxu1 %v3291_v44 }
  0x63   :  { %1564 = vmatpush1.bf16.msra.mxu0 %v2708_v43  ;;  %1730 = vmatpush1.bf16.msra.mxu1 %v2711_v45  ;;  %v2789_v43 = vld [vmem:[%s3795_s1 + $0x160] ss:$28 sps:$4 sm:$0xff]  }
  0x64   :  { %1565 = vmatprep.subr.bf16.mxu0 %v2716_v46  ;;  %1731 = vmatprep.subr.bf16.mxu1 %v2719_v48  ;;  %v2796_v45 = vld [vmem:[%s3795_s1 + $0x19c] ss:$28 sps:$4 sm:$0xff]   ;;  %v2797_v46 = vld [vmem:[%s3795_s1 + $0x130] ss:$28 sps:$4 sm:$0xff]  }
  0x65   :  { %2425 = vmatprep.mubr.msk.bf16.mxu0 %vm1448_vm0, %v3305_v49  ;;  %2430 = vmatprep.mubr.msk.bf16.mxu1 %vm1448_vm0, %v3305_v49  ;;  %v3504_v48 = vld [vmem:[%s3794_s0 + $0x8c] ss:$16 sps:$4 sm:$0xff]  }
  0x67   :  { %1566 = vmatpush1.bf16.msra.mxu0 %v2714_v50  ;;  %1732 = vmatpush1.bf16.msra.mxu1 %v2717_v51  ;;  %v2800_v50 = vld [vmem:[%s3795_s1 + $0x328] ss:$28 sps:$4 sm:$0xff]   ;;  %v2794_v51 = vld [vmem:[%s3795_s1 + $0x198] ss:$28 sps:$4 sm:$0xff]  }
  0x68   :  { %1567 = vmatprep.subr.bf16.mxu0 %v2725_v52  ;;  %1733 = vmatprep.subr.bf16.mxu1 %v2728_v53  ;;  %v2805_v52 = vld [vmem:[%s3795_s1 + $0x168] ss:$28 sps:$4 sm:$0xff]   ;;  %v2804_v53 = vld [vmem:[%s3795_s1 + $0x1d4] ss:$28 sps:$4 sm:$0xff]  }
  0x6b   :  { %1568 = vmatpush1.bf16.msra.mxu0 %v2723_v54  ;;  %1734 = vmatpush1.bf16.msra.mxu1 %v2726_v55  ;;  %v2806_v54 = vld [vmem:[%s3795_s1 + $0x360] ss:$28 sps:$4 sm:$0xff]   ;;  %v3530_v55 = vld [vmem:[%s3794_s0 + $0x88] ss:$16 sps:$4 sm:$0xff]  }
  0x6c   :  { %1569 = vmatprep.subr.bf16.mxu0 %v2731_v56  ;;  %1735 = vmatprep.subr.bf16.mxu1 %v2734_v57  ;;  %v2802_v56 = vld [vmem:[%s3795_s1 + $0x1d0] ss:$28 sps:$4 sm:$0xff]   ;;  %v2810_v57 = vld [vmem:[%s3795_s1 + $0x1a0] ss:$28 sps:$4 sm:$0xff]  }
  0x6f   :  { %1570 = vmatpush1.bf16.msra.mxu0 %v2729_v58  ;;  %1736 = vmatpush1.bf16.msra.mxu1 %v2732_v59  ;;  %v2809_v58 = vld [vmem:[%s3795_s1 + $0x20c] ss:$28 sps:$4 sm:$0xff]  }
  0x70   :  { %1571 = vmatprep.subr.bf16.mxu0 %v2740_v60  ;;  %1737 = vmatprep.subr.bf16.mxu1 %v2743_v61  ;;  %v2807_v59 = vld [vmem:[%s3795_s1 + $0x208] ss:$28 sps:$4 sm:$0xff]   ;;  %v2909_v61 = vmov 0  }
  0x71   :  { %v2813_v60 = vld [vmem:[%s3795_s1 + $0x244] ss:$28 sps:$4 sm:$0xff]  }
  0x73   :  { %1572 = vmatpush1.bf16.msra.mxu0 %v2738_v62  ;;  %1738 = vmatpush1.bf16.msra.mxu1 %v2741_v63  ;;  %v2811_v62 = vld [vmem:[%s3795_s1 + $0x240] ss:$28 sps:$4 sm:$0xff]   ;;  %v2814_v63 = vld [vmem:[%s3795_s1 + $0x398] ss:$28 sps:$4 sm:$0xff]  }
  0x74   :  { %1573 = vmatprep.subr.bf16.mxu0 %v2746_v0  ;;  %1739 = vmatprep.subr.bf16.mxu1 %v2749_v1  ;;  %v2817_v0 = vld [vmem:[%s3795_s1 + $0x27c] ss:$28 sps:$4 sm:$0xff]  }
  0x77   :  { %1574 = vmatpush1.bf16.msra.mxu0 %v2744_v2  ;;  %1740 = vmatpush1.bf16.msra.mxu1 %v2747_v3 }
  0x78   :  { %1796 = vmatprep.subr.bf16.mxu0 %v2755_v4  ;;  %2445 = vmatprep.subr.bf16.mxu1 %v2761_v6 }
  0x7a   :  { %1580 = vmatmul.mubr.bf16.vlgmr.msra.gmra.mrb[0].mxu0 %v3376_v7  ;;  %1746 = vmatmul.mubr.bf16.vlgmr.msra.gmra.mrb[0].mxu1 %v3376_v7 }
  0x7b   :  { %1797 = vmatpush1.bf16.msra.mxu0 %v2753_v9  ;;  %2426 = vmatprep.mubr.msk.bf16.mxu0 %vm1448_vm0, %v3384_v10 }
  0x7c   :  { %1798 = vmatprep.subr.bf16.mxu0 %v2758_v11  ;;  %2431 = vmatprep.mubr.msk.bf16.mxu1 %vm1448_vm0, %v3384_v10 }
  0x7d   :  { %2446 = vmatpush3.bf16.msra.mxu1 %v2766_v12 }
  0x7e   :  { %2447 = vmatprep.subr.bf16.mxu1 %v2767_v13 }
  0x7f   :  { %1799 = vmatpush1.bf16.msra.mxu0 %v2756_v14 }
  0x80   :  { %1800 = vmatprep.subr.bf16.mxu0 %v2765_v16 }
  0x81   :  { %2448 = vmatpush3.bf16.msra.mxu1 %v2771_v17 }
  0x82   :  { %1590 = vmatmul.mubr.bf16.gmra.mrb[4].mxu0 %v3413_v19  ;;  %1756 = vmatmul.mubr.bf16.gmra.mrb[4].mxu1 %v3413_v19 }
  0x83   :  { %1801 = vmatpush1.bf16.msra.mxu0 %v2763_v20  ;;  %2427 = vmatprep.mubr.msk.bf16.mxu0 %vm1448_vm0, %v3421_v21 }
  0x84   :  { %1802 = vmatprep.subr.bf16.mxu0 %v2770_v22  ;;  %2432 = vmatprep.mubr.msk.bf16.mxu1 %vm1448_vm0, %v3421_v21 }
  0x85   :  { %2449 = vmatprep.subr.bf16.mxu1 %v2774_v24 }
  0x86   :  { %2450 = vmatpush3.bf16.msra.mxu1 %v2779_v26 }
  0x87   :  { %1803 = vmatpush1.bf16.msra.mxu0 %v2768_v23  ;;  %2451 = vmatprep.subr.bf16.mxu1 %v2780_v27 }
  0x88   :  { %1804 = vmatprep.subr.bf16.mxu0 %v2778_v29 }
  0x8a   :  { %1600 = vmatmul.mubr.bf16.gmra.mrb[8].mxu0 %v3450_v30  ;;  %1766 = vmatmul.mubr.bf16.gmra.mrb[8].mxu1 %v3450_v30 }
  0x8b   :  { %1805 = vmatpush1.bf16.msra.mxu0 %v2776_v31  ;;  %2452 = vmatpush3.bf16.msra.mxu1 %v2784_v32 }
  0x8c   :  { %1806 = vmatprep.subr.bf16.mxu0 %v2783_v33  ;;  %2428 = vmatprep.mubr.msk.bf16.mxu0 %vm1448_vm0, %v3464_v34 }
  0x8d   :  { %2433 = vmatprep.mubr.msk.bf16.mxu1 %vm1448_vm0, %v3464_v34  ;;  %2453 = vmatprep.subr.bf16.mxu1 %v2787_v37 }
  0x8f   :  { %1807 = vmatpush1.bf16.msra.mxu0 %v2781_v36  ;;  %2454 = vmatpush3.bf16.msra.mxu1 %v2792_v40 }
  0x90   :  { %1808 = vmatprep.subr.bf16.mxu0 %v2791_v39  ;;  %2455 = vmatprep.subr.bf16.mxu1 %v2793_v41 }
  0x92   :  { %1610 = vmatmul.mubr.bf16.gmra.mrb[12].mxu0 %v3490_v42  ;;  %1776 = vmatmul.mubr.bf16.gmra.mrb[12].mxu1 %v3490_v42 }
  0x93   :  { %1809 = vmatpush1.bf16.msra.mxu0 %v2789_v43  ;;  %2456 = vmatpush3.bf16.msra.mxu1 %v2797_v46 }
  0x94   :  { %1810 = vmatprep.subr.bf16.mxu0 %v2796_v45  ;;  %2429 = vmatprep.mubr.msk.bf16.mxu0 %vm1448_vm0, %v3504_v48 }
  0x95   :  { %2434 = vmatprep.mubr.msk.bf16.mxu1 %vm1448_vm0, %v3504_v48  ;;  %2457 = vmatprep.subr.bf16.mxu1 %v2800_v50 }
  0x97   :  { %1811 = vmatpush1.bf16.msra.mxu0 %v2794_v51  ;;  %2458 = vmatpush3.bf16.msra.mxu1 %v2805_v52 }
  0x98   :  { %1812 = vmatprep.subr.bf16.mxu0 %v2804_v53  ;;  %2459 = vmatprep.subr.bf16.mxu1 %v2806_v54 }
  0x9a   :  { %1620 = vmatmul.mubr.bf16.gmra.mrb[16].mxu0 %v3530_v55  ;;  %1786 = vmatmul.mubr.bf16.gmra.mrb[16].mxu1 %v3530_v55 }
  0x9b   :  { %1813 = vmatpush1.bf16.msra.mxu0 %v2802_v56  ;;  %2460 = vmatpush3.bf16.msra.mxu1 %v2810_v57 }
  0x9c   :  { %1814 = vmatprep.subr.bf16.mxu0 %v2809_v58  ;;  %1994 = vmatprep.mubr.bf16.mxu1 %v3072_v47 }
  0x9d   :  { %2035 = vmatprep.subr.bf16.mxu1 %v2909_v61  ;;  %1828 = vmatprep.mubr.bf16.mxu0 %v3072_v47 }
  0x9f   :  { %1815 = vmatpush1.bf16.msra.mxu0 %v2807_v59 }
  0xa0   :  { %1816 = vmatprep.subr.bf16.mxu0 %v2813_v60 }
  0xa2   :  { %1995 = vmatmul.mubr.bf16.vlgmr.msra.gmra.mrb[20].mxu1 %v3142_v5 }
  0xa3   :  { %7 = vsyncpa [#allocation3], 0  ;;  %2036 = vmatpush1.bf16.msra.mxu1 %v2814_v63  ;;  %1817 = vmatpush1.bf16.msra.mxu0 %v2811_v62  ;;  %v2815_v47 = vld [vmem:[%s3795_s1 + $0x278] ss:$28 sps:$4 sm:$0xff]   ;;  %v2818_v1 = vld [vmem:[%s3795_s1 + $0x3d0] ss:$28 sps:$4 sm:$0xff]  }
  0xa4   :  { %2037 = vmatprep.subr.bf16.mxu1 %v2909_v61  ;;  %1818 = vmatprep.subr.bf16.mxu0 %v2817_v0  ;;  %v2821_v2 = vld [vmem:[%s3795_s1 + $0x2b4] ss:$28 sps:$4 sm:$0xff]   ;;  %v2822_v4 = vld [vmem:[%s3795_s1 + $0x408] ss:$28 sps:$4 sm:$0xff]   ;;  %v2826_v11 = vld [vmem:[%s3795_s1 + $0x440] ss:$28 sps:$4 sm:$0xff]  }
  0xa5   :  { %2002 = vmatprep.mubr.bf16.mxu1 %v3153_v8  ;;  %v2819_v3 = vld [vmem:[%s3795_s1 + $0x2b0] ss:$28 sps:$4 sm:$0xff]   ;;  %v2823_v9 = vld [vmem:[%s3795_s1 + $0x2e8] ss:$28 sps:$4 sm:$0xff]   ;;  %v2827_v13 = vld [vmem:[%s3795_s1 + $0x320] ss:$28 sps:$4 sm:$0xff]  }
  0xa6   :  { %v2825_v6 = vld [vmem:[%s3795_s1 + $0x2ec] ss:$28 sps:$4 sm:$0xff]   ;;  %v2829_v12 = vld [vmem:[%s3795_s1 + $0x324] ss:$28 sps:$4 sm:$0xff]   ;;  %v2830_v14 = vld [vmem:[%s3795_s1 + $0x478] ss:$28 sps:$4 sm:$0xff]  }
  0xa7   :  { %2038 = vmatpush1.bf16.msra.mxu1 %v2818_v1  ;;  %1819 = vmatpush1.bf16.msra.mxu0 %v2815_v47  ;;  %v2833_v16 = vld [vmem:[%s3795_s1 + $0x35c] ss:$28 sps:$4 sm:$0xff]   ;;  %v2834_v20 = vld [vmem:[%s3795_s1 + $0x4b0] ss:$28 sps:$4 sm:$0xff]   ;;  %v2838_v24 = vld [vmem:[%s3795_s1 + $0x4e8] ss:$28 sps:$4 sm:$0xff]  }
  0xa8   :  { %2039 = vmatprep.subr.bf16.mxu1 %v2909_v61  ;;  %1820 = vmatprep.subr.bf16.mxu0 %v2821_v2  ;;  %v2831_v17 = vld [vmem:[%s3795_s1 + $0x358] ss:$28 sps:$4 sm:$0xff]   ;;  %v2835_v23 = vld [vmem:[%s3795_s1 + $0x390] ss:$28 sps:$4 sm:$0xff]   ;;  %v2839_v27 = vld [vmem:[%s3795_s1 + $0x3c8] ss:$28 sps:$4 sm:$0xff]  }
  0xa9   :  { %v2837_v22 = vld [vmem:[%s3795_s1 + $0x394] ss:$28 sps:$4 sm:$0xff]   ;;  %v2841_v26 = vld [vmem:[%s3795_s1 + $0x3cc] ss:$28 sps:$4 sm:$0xff]   ;;  %v2842_v29 = vld [vmem:[%s3795_s1 + $0x520] ss:$28 sps:$4 sm:$0xff]  }
  0xaa   :  { %2003 = vmatmul.mubr.bf16.gmra.mrb[24].mxu1 %v3180_v15  ;;  %v2845_v31 = vld [vmem:[%s3795_s1 + $0x404] ss:$28 sps:$4 sm:$0xff]   ;;  %v2846_v32 = vld [vmem:[%s3795_s1 + $0x558] ss:$28 sps:$4 sm:$0xff]   ;;  %v2850_v36 = vld [vmem:[%s3795_s1 + $0x590] ss:$28 sps:$4 sm:$0xff]  }
  0xab   :  { %2040 = vmatpush1.bf16.msra.mxu1 %v2822_v4  ;;  %1821 = vmatpush1.bf16.msra.mxu0 %v2819_v3  ;;  %v2849_v33 = vld [vmem:[%s3795_s1 + $0x43c] ss:$28 sps:$4 sm:$0xff]   ;;  %v2853_v37 = vld [vmem:[%s3795_s1 + $0x474] ss:$28 sps:$4 sm:$0xff]   ;;  %v2854_v39 = vld [vmem:[%s3795_s1 + $0x5c8] ss:$28 sps:$4 sm:$0xff]  }
  0xac   :  { %2041 = vmatprep.subr.bf16.mxu1 %v2909_v61  ;;  %1822 = vmatprep.subr.bf16.mxu0 %v2825_v6  ;;  %v2857_v40 = vld [vmem:[%s3795_s1 + $0x4ac] ss:$28 sps:$4 sm:$0xff]   ;;  %v2858_v41 = vld [vmem:[%s3795_s1 + $0x600] ss:$28 sps:$4 sm:$0xff]   ;;  %v2862_v45 = vld [vmem:[%s3795_s1 + $0x638] ss:$28 sps:$4 sm:$0xff]  }
  0xad   :  { %2010 = vmatprep.mubr.bf16.mxu1 %v3191_v18  ;;  %v2861_v43 = vld [vmem:[%s3795_s1 + $0x4e4] ss:$28 sps:$4 sm:$0xff]   ;;  %v2865_v46 = vld [vmem:[%s3795_s1 + $0x51c] ss:$28 sps:$4 sm:$0xff]   ;;  %v2866_v50 = vld [vmem:[%s3795_s1 + $0x670] ss:$28 sps:$4 sm:$0xff]  }
  0xae   :  { %v2869_v51 = vld [vmem:[%s3795_s1 + $0x554] ss:$28 sps:$4 sm:$0xff]   ;;  %v2872_v52 = vld [vmem:[%s3795_s1 + $0x58c] ss:$28 sps:$4 sm:$0xff]   ;;  %v2875_v53 = vld [vmem:[%s3795_s1 + $0x5c4] ss:$28 sps:$4 sm:$0xff]  }
  0xaf   :  { %2042 = vmatpush1.bf16.msra.mxu1 %v2826_v11  ;;  %1823 = vmatpush1.bf16.msra.mxu0 %v2823_v9  ;;  %v2878_v54 = vld [vmem:[%s3795_s1 + $0x5fc] ss:$28 sps:$4 sm:$0xff]   ;;  %v2879_v57 = vld [vmem:[%s3795_s1 + $0x630] ss:$28 sps:$4 sm:$0xff]   ;;  %v2882_v59 = vld [vmem:[%s3795_s1 + $0x668] ss:$28 sps:$4 sm:$0xff]  }
  0xb0   :  { %2043 = vmatprep.subr.bf16.mxu1 %v2909_v61  ;;  %1824 = vmatprep.subr.bf16.mxu0 %v2829_v12  ;;  %v2876_v56 = vld [vmem:[%s3795_s1 + $0x5f8] ss:$28 sps:$4 sm:$0xff]   ;;  %v2884_v58 = vld [vmem:[%s3795_s1 + $0x66c] ss:$28 sps:$4 sm:$0xff]   ;;  %vm2114_vm1 = vcmask 130048  }
  0xb2   :  { %2011 = vmatmul.mubr.bf16.gmra.mrb[28].mxu1 %v3218_v25 }
  0xb3   :  { %2044 = vmatpush1.bf16.msra.mxu1 %v2830_v14  ;;  %1825 = vmatpush1.bf16.msra.mxu0 %v2827_v13 }
  0xb4   :  { %2045 = vmatprep.subr.bf16.mxu1 %v2909_v61  ;;  %1826 = vmatprep.subr.bf16.mxu0 %v2833_v16 }
  0xb5   :  { %2018 = vmatprep.mubr.bf16.mxu1 %v3229_v28 }
  0xb7   :  { %2046 = vmatpush1.bf16.msra.mxu1 %v2834_v20  ;;  %1827 = vmatpush1.bf16.msra.mxu0 %v2831_v17 }
  0xb8   :  { %2047 = vmatprep.subr.bf16.mxu1 %v2909_v61  ;;  %1879 = vmatprep.subr.bf16.mxu0 %v2837_v22 }
  0xba   :  { %1829 = vmatmul.mubr.bf16.vlgmr.msra.gmra.mrb[20].mxu0 %v3142_v5  ;;  %2019 = vmatmul.mubr.bf16.gmra.mrb[32].mxu1 %v3256_v35  ;;  %v2843_v5 = vld [vmem:[%s3795_s1 + $0x400] ss:$28 sps:$4 sm:$0xff]  }
  0xbb   :  { %2048 = vmatpush1.bf16.msra.mxu1 %v2838_v24  ;;  %1880 = vmatpush1.bf16.msra.mxu0 %v2835_v23 }
  0xbc   :  { %2049 = vmatprep.subr.bf16.mxu1 %v2909_v61  ;;  %1881 = vmatprep.subr.bf16.mxu0 %v2841_v26 }
  0xbd   :  { %2026 = vmatprep.mubr.bf16.mxu1 %v3267_v38  ;;  %1838 = vmatprep.mubr.bf16.mxu0 %v3153_v8  ;;  %v2847_v8 = vld [vmem:[%s3795_s1 + $0x438] ss:$28 sps:$4 sm:$0xff]  }
  0xbf   :  { %2050 = vmatpush1.bf16.msra.mxu1 %v2842_v29  ;;  %1882 = vmatpush1.bf16.msra.mxu0 %v2839_v27 }
  0xc0   :  { %2051 = vmatprep.subr.bf16.mxu1 %v2909_v61  ;;  %1883 = vmatprep.subr.bf16.mxu0 %v2845_v31 }
  0xc2   :  { %2027 = vmatmul.mubr.bf16.gmra.mrb[36].mxu1 %v3291_v44  ;;  %1839 = vmatmul.mubr.bf16.gmra.mrb[24].mxu0 %v3180_v15  ;;  %v2851_v15 = vld [vmem:[%s3795_s1 + $0x470] ss:$28 sps:$4 sm:$0xff]  }
  0xc3   :  { %2052 = vmatpush1.bf16.msra.mxu1 %v2846_v32  ;;  %1884 = vmatpush1.bf16.msra.mxu0 %v2843_v5 }
  0xc4   :  { %2053 = vmatprep.subr.bf16.mxu1 %v2909_v61  ;;  %1885 = vmatprep.subr.bf16.mxu0 %v2849_v33 }
  0xc5   :  { %2440 = vmatprep.mubr.msk.bf16.mxu1 %vm1448_vm0, %v3305_v49  ;;  %1848 = vmatprep.mubr.bf16.mxu0 %v3191_v18  ;;  %v2855_v18 = vld [vmem:[%s3795_s1 + $0x4a8] ss:$28 sps:$4 sm:$0xff]  }
  0xc7   :  { %2054 = vmatpush1.bf16.msra.mxu1 %v2850_v36  ;;  %1886 = vmatpush1.bf16.msra.mxu0 %v2847_v8 }
  0xc8   :  { %2055 = vmatprep.subr.bf16.mxu1 %v2909_v61  ;;  %1887 = vmatprep.subr.bf16.mxu0 %v2853_v37 }
  0xca   :  { %1849 = vmatmul.mubr.bf16.gmra.mrb[28].mxu0 %v3218_v25  ;;  %v2859_v25 = vld [vmem:[%s3795_s1 + $0x4e0] ss:$28 sps:$4 sm:$0xff]  }
  0xcb   :  { %2056 = vmatpush1.bf16.msra.mxu1 %v2854_v39  ;;  %1888 = vmatpush1.bf16.msra.mxu0 %v2851_v15 }
  0xcc   :  { %2057 = vmatprep.subr.bf16.mxu1 %v2909_v61  ;;  %1889 = vmatprep.subr.bf16.mxu0 %v2857_v40 }
  0xcd   :  { %1858 = vmatprep.mubr.bf16.mxu0 %v3229_v28  ;;  %v2863_v28 = vld [vmem:[%s3795_s1 + $0x518] ss:$28 sps:$4 sm:$0xff]  }
  0xcf   :  { %2058 = vmatpush1.bf16.msra.mxu1 %v2858_v41  ;;  %1890 = vmatpush1.bf16.msra.mxu0 %v2855_v18 }
  0xd0   :  { %2059 = vmatprep.subr.bf16.mxu1 %v2909_v61  ;;  %1891 = vmatprep.subr.bf16.mxu0 %v2861_v43 }
  0xd2   :  { %1859 = vmatmul.mubr.bf16.gmra.mrb[32].mxu0 %v3256_v35  ;;  %v2867_v35 = vld [vmem:[%s3795_s1 + $0x550] ss:$28 sps:$4 sm:$0xff]  }
  0xd3   :  { %2060 = vmatpush1.bf16.msra.mxu1 %v2862_v45  ;;  %1892 = vmatpush1.bf16.msra.mxu0 %v2859_v25 }
  0xd4   :  { %2061 = vmatprep.subr.bf16.mxu1 %v2909_v61  ;;  %1893 = vmatprep.subr.bf16.mxu0 %v2865_v46 }
  0xd5   :  { %1868 = vmatprep.mubr.bf16.mxu0 %v3267_v38  ;;  %v2870_v38 = vld [vmem:[%s3795_s1 + $0x588] ss:$28 sps:$4 sm:$0xff]  }
  0xd7   :  { %2062 = vmatpush1.bf16.msra.mxu1 %v2866_v50  ;;  %1894 = vmatpush1.bf16.msra.mxu0 %v2863_v28 }
  0xd8   :  { %1895 = vmatprep.subr.bf16.mxu0 %v2869_v51 }
  0xda   :  { %2068 = vmatmul.mubr.bf16.vlgmr.msra.gmra.mrb[40].mxu1 %v3376_v7  ;;  %1869 = vmatmul.mubr.bf16.gmra.mrb[36].mxu0 %v3291_v44  ;;  %v2873_v44 = vld [vmem:[%s3795_s1 + $0x5c0] ss:$28 sps:$4 sm:$0xff]  }
  0xdb   :  { %1896 = vmatpush1.bf16.msra.mxu0 %v2867_v35  ;;  %2441 = vmatprep.mubr.msk.bf16.mxu1 %vm1448_vm0, %v3384_v10 }
  0xdc   :  { %1897 = vmatprep.subr.bf16.mxu0 %v2872_v52  ;;  %2435 = vmatprep.mubr.msk.bf16.mxu0 %vm1448_vm0, %v3305_v49  ;;  %v2881_v49 = vld [vmem:[%s3795_s1 + $0x634] ss:$28 sps:$4 sm:$0xff]   ;;  %s2910_s1 = smov [#allocation2]  }
  0xdd   :  { %s2184_s17 = sshll.u32 %s2910_s1, 4  ;;  %s2185_s17 = int_to_ptr.vmem [resolvable:$true] %s2184_s17 }
  0xde   :  { %s2885_s18 = scalar_lea.vmem %s2185_s17, 8960  ;;  %p2890_p1 = scmp.lt.s32.totalorder %s2185_s17, %s2185_s17 }
  0xdf   :  { %1898 = vmatpush1.bf16.msra.mxu0 %v2870_v38  ;;  %p2886_p0 = scmp.ne.s32.totalorder %s2185_s17, %s2885_s18  ;;  %p2891_p2 = scmp.lt.s32.totalorder %s2885_s18, %s2885_s18 }
  0xe0   :  { %1899 = vmatprep.subr.bf16.mxu0 %v2875_v53 }
  0xe1   :  { %p2892_p3 = por %p2891_p2, %p2890_p1 }
  0xe2   :  { %2076 = vmatmul.mubr.bf16.gmra.mrb[44].mxu1 %v3413_v19 }
  0xe3   :  { %1900 = vmatpush1.bf16.msra.mxu0 %v2873_v44  ;;  %2442 = vmatprep.mubr.msk.bf16.mxu1 %vm1448_vm0, %v3421_v21  ;;  %p2893_p4 = pnand %p2892_p3, %p2886_p0 }
  0xe4   :  { %1901 = vmatprep.subr.bf16.mxu0 %v2878_v54 }
  0xe7   :  { %1902 = vmatpush1.bf16.msra.mxu0 %v2876_v56 }
  0xe8   :  { %1903 = vmatprep.subr.bf16.mxu0 %v2881_v49 }
  0xea   :  { %2084 = vmatmul.mubr.bf16.gmra.mrb[48].mxu1 %v3450_v30 }
  0xeb   :  { %1904 = vmatpush1.bf16.msra.mxu0 %v2879_v57  ;;  %2443 = vmatprep.mubr.msk.bf16.mxu1 %vm1448_vm0, %v3464_v34 }
  0xec   :  { %1905 = vmatprep.subr.bf16.mxu0 %v2884_v58 }
  0xef   :  { %1906 = vmatpush1.bf16.msra.mxu0 %v2882_v59 }
  0xf2   :  { %2092 = vmatmul.mubr.bf16.gmra.mrb[52].mxu1 %v3490_v42  ;;  %1912 = vmatmul.mubr.bf16.vlgmr.msra.gmra.mrb[20].mxu0 %v3376_v7 }
  0xf3   :  { %2444 = vmatprep.mubr.msk.bf16.mxu1 %vm1448_vm0, %v3504_v48  ;;  %2436 = vmatprep.mubr.msk.bf16.mxu0 %vm1448_vm0, %v3384_v10 }
  0xfa   :  { %2100 = vmatmul.mubr.bf16.gmra.mrb[56].mxu1 %v3530_v55  ;;  %1922 = vmatmul.mubr.bf16.gmra.mrb[24].mxu0 %v3413_v19 }
  0xfb   :  { %2437 = vmatprep.mubr.msk.bf16.mxu0 %vm1448_vm0, %v3421_v21 }
 0x102   :  { %1932 = vmatmul.mubr.bf16.gmra.mrb[28].mxu0 %v3450_v30 }
 0x103   :  { %2438 = vmatprep.mubr.msk.bf16.mxu0 %vm1448_vm0, %v3464_v34 }
 0x10a   :  { %1942 = vmatmul.mubr.bf16.gmra.mrb[32].mxu0 %v3490_v42 }
 0x10b   :  { %2439 = vmatprep.mubr.msk.bf16.mxu0 %vm1448_vm0, %v3504_v48 }
 0x112   :  { %1952 = vmatmul.mubr.bf16.gmra.mrb[36].mxu0 %v3530_v55 }
 0x14d   :  { %v1581_v7 = vpop.f32.mrb[0].mxu0  ;;  %v1747_v10 = vpop.f32.mrb[0].mxu1 }
 0x14e   :  { %2108 = vst [vmem:[#allocation2] sm:$0xff] %v1581_v7  ;;  %2110 = vst [vmem:[#allocation2 + $0x10] sm:$0xff] %v1747_v10  ;;  %v1583_v19 = vpop.f32.mrb[1].mxu0  ;;  %v1749_v60 = vpop.f32.mrb[1].mxu1 }
 0x14f   :  { %2109 = vst [vmem:[#allocation2 + $0x8] sm:$0xff] %v1583_v19  ;;  %2111 = vst [vmem:[#allocation2 + $0x18] sm:$0xff] %v1749_v60  ;;  %v1585_v21 = vpop.f32.mrb[2].mxu0  ;;  %v1751_v30 = vpop.f32.mrb[2].mxu1 }
 0x150   :  { %2116 = vst [vmem:[#allocation2 + $0x38] sm:$0xff] %v1585_v21  ;;  %2118 = vst [vmem:[#allocation2 + $0x48] sm:$0xff] %v1751_v30  ;;  %v1587_v34 = vpop.f32.mrb[3].mxu0  ;;  %v1753_v61 = vpop.f32.mrb[3].mxu1 }
 0x151   :  { %2117 = vst [vmem:[#allocation2 + $0x40] sm:$0xff] %v1587_v34  ;;  %2119 = vst [vmem:[#allocation2 + $0x50] sm:$0xff] %v1753_v61 }
 0x155   :  { %v1591_v42 = vpop.f32.mrb[4].mxu0  ;;  %v1757_v48 = vpop.f32.mrb[4].mxu1 }
 0x156   :  { %2123 = vst [vmem:[#allocation2 + $0x70] sm:$0xff] %v1591_v42  ;;  %2125 = vst [vmem:[#allocation2 + $0x80] sm:$0xff] %v1757_v48  ;;  %v1593_v55 = vpop.f32.mrb[5].mxu0  ;;  %v1759_v62 = vpop.f32.mrb[5].mxu1 }
 0x157   :  { %2124 = vst [vmem:[#allocation2 + $0x78] sm:$0xff] %v1593_v55  ;;  %2126 = vst [vmem:[#allocation2 + $0x88] sm:$0xff] %v1759_v62  ;;  %v1595_v63 = vpop.f32.mrb[6].mxu0  ;;  %v1761_v0 = vpop.f32.mrb[6].mxu1 }
 0x158   :  { %2130 = vst [vmem:[#allocation2 + $0xa8] sm:$0xff] %v1595_v63  ;;  %2132 = vst [vmem:[#allocation2 + $0xb8] sm:$0xff] %v1761_v0  ;;  %v1597_v47 = vpop.f32.mrb[7].mxu0  ;;  %v1763_v1 = vpop.f32.mrb[7].mxu1 }
 0x159   :  { %2131 = vst [vmem:[#allocation2 + $0xb0] sm:$0xff] %v1597_v47  ;;  %2133 = vst [vmem:[#allocation2 + $0xc0] sm:$0xff] %v1763_v1 }
 0x15d   :  { %v1601_v2 = vpop.f32.mrb[8].mxu0  ;;  %v1767_v3 = vpop.f32.mrb[8].mxu1 }
 0x15e   :  { %2137 = vst [vmem:[#allocation2 + $0xe0] sm:$0xff] %v1601_v2  ;;  %2139 = vst [vmem:[#allocation2 + $0xf0] sm:$0xff] %v1767_v3  ;;  %v1603_v4 = vpop.f32.mrb[9].mxu0  ;;  %v1769_v6 = vpop.f32.mrb[9].mxu1 }
 0x15f   :  { %2138 = vst [vmem:[#allocation2 + $0xe8] sm:$0xff] %v1603_v4  ;;  %2140 = vst [vmem:[#allocation2 + $0xf8] sm:$0xff] %v1769_v6  ;;  %v1605_v9 = vpop.f32.mrb[10].mxu0  ;;  %v1771_v11 = vpop.f32.mrb[10].mxu1 }
 0x160   :  { %2144 = vst [vmem:[#allocation2 + $0x118] sm:$0xff] %v1605_v9  ;;  %2146 = vst [vmem:[#allocation2 + $0x128] sm:$0xff] %v1771_v11  ;;  %v1607_v12 = vpop.f32.mrb[11].mxu0  ;;  %v1773_v13 = vpop.f32.mrb[11].mxu1 }
 0x161   :  { %2145 = vst [vmem:[#allocation2 + $0x120] sm:$0xff] %v1607_v12  ;;  %2147 = vst [vmem:[#allocation2 + $0x130] sm:$0xff] %v1773_v13 }
 0x165   :  { %v1611_v14 = vpop.f32.mrb[12].mxu0  ;;  %v1777_v16 = vpop.f32.mrb[12].mxu1 }
 0x166   :  { %2151 = vst [vmem:[#allocation2 + $0x150] sm:$0xff] %v1611_v14  ;;  %2153 = vst [vmem:[#allocation2 + $0x160] sm:$0xff] %v1777_v16  ;;  %v1613_v17 = vpop.f32.mrb[13].mxu0  ;;  %v1779_v20 = vpop.f32.mrb[13].mxu1 }
 0x167   :  { %2152 = vst [vmem:[#allocation2 + $0x158] sm:$0xff] %v1613_v17  ;;  %2154 = vst [vmem:[#allocation2 + $0x168] sm:$0xff] %v1779_v20  ;;  %v1615_v22 = vpop.f32.mrb[14].mxu0  ;;  %v1781_v23 = vpop.f32.mrb[14].mxu1 }
 0x168   :  { %2158 = vst [vmem:[#allocation2 + $0x188] sm:$0xff] %v1615_v22  ;;  %2160 = vst [vmem:[#allocation2 + $0x198] sm:$0xff] %v1781_v23  ;;  %v1617_v24 = vpop.f32.mrb[15].mxu0  ;;  %v1783_v26 = vpop.f32.mrb[15].mxu1 }
 0x169   :  { %2159 = vst [vmem:[#allocation2 + $0x190] sm:$0xff] %v1617_v24  ;;  %2161 = vst [vmem:[#allocation2 + $0x1a0] sm:$0xff] %v1783_v26 }
 0x16d   :  { %v1621_v27 = vpop.f32.mrb[16].mxu0  ;;  %v1787_v29 = vpop.f32.mrb[16].mxu1 }
 0x16e   :  { %2165 = vst [vmem:[#allocation2 + $0x1c0] sm:$0xff] %v1621_v27  ;;  %2167 = vst [vmem:[#allocation2 + $0x1d0] sm:$0xff] %v1787_v29  ;;  %v1623_v31 = vpop.f32.mrb[17].mxu0  ;;  %v1789_v5 = vpop.f32.mrb[17].mxu1 }
 0x16f   :  { %2166 = vst [vmem:[#allocation2 + $0x1c8] sm:$0xff] %v1623_v31  ;;  %2168 = vst [vmem:[#allocation2 + $0x1d8] sm:$0xff] %v1789_v5  ;;  %v1625_v32 = vpop.f32.mrb[18].mxu0  ;;  %v1791_v33 = vpop.f32.mrb[18].mxu1 }
 0x170   :  { %2172 = vst [vmem:[#allocation2 + $0x1f8] sm:$0xff] %v1625_v32  ;;  %2174 = vst [vmem:[#allocation2 + $0x208] sm:$0xff] %v1791_v33  ;;  %v1627_v8 = vpop.f32.mrb[19].mxu0  ;;  %v1793_v36 = vpop.f32.mrb[19].mxu1 }
 0x171   :  { %2173 = vst [vmem:[#allocation2 + $0x200] sm:$0xff] %v1627_v8  ;;  %2175 = vst [vmem:[#allocation2 + $0x210] sm:$0xff] %v1793_v36 }
 0x175   :  { %v2461_v37 = vpop.f32.mrb[20].mxu1 }
 0x176   :  { %v2462_v15 = vpop.f32.mrb[21].mxu1 }
 0x177   :  { %v2463_v39 = vadd.f32 %v2462_v15, %v2461_v37  ;;  %v2464_v40 = vpop.f32.mrb[22].mxu1 }
 0x178   :  { %v2465_v18 = vpop.f32.mrb[23].mxu1 }
 0x179   :  { %v2466_v41 = vadd.f32 %v2465_v18, %v2464_v40 }
 0x17d   :  { %v2467_v43 = vpop.f32.mrb[24].mxu1 }
 0x17e   :  { %v2468_v25 = vpop.f32.mrb[25].mxu1 }
 0x17f   :  { %v2469_v45 = vadd.f32 %v2468_v25, %v2467_v43  ;;  %v2470_v46 = vpop.f32.mrb[26].mxu1 }
 0x180   :  { %v2471_v28 = vpop.f32.mrb[27].mxu1 }
 0x181   :  { %v2472_v50 = vadd.f32 %v2471_v28, %v2470_v46 }
 0x185   :  { %v2473_v51 = vpop.f32.mrb[28].mxu1 }
 0x186   :  { %v2474_v35 = vpop.f32.mrb[29].mxu1 }
 0x187   :  { %v2475_v52 = vadd.f32 %v2474_v35, %v2473_v51  ;;  %v2476_v38 = vpop.f32.mrb[30].mxu1 }
 0x188   :  { %v2477_v53 = vpop.f32.mrb[31].mxu1 }
 0x189   :  { %v2478_v44 = vadd.f32 %v2477_v53, %v2476_v38 }
 0x18d   :  { %v2479_v54 = vpop.f32.mrb[32].mxu1 }
 0x18e   :  { %v2480_v56 = vpop.f32.mrb[33].mxu1 }
 0x18f   :  { %v2481_v49 = vadd.f32 %v2480_v56, %v2479_v54  ;;  %v2482_v57 = vpop.f32.mrb[34].mxu1 }
 0x190   :  { %v2483_v58 = vpop.f32.mrb[35].mxu1 }
 0x191   :  { %v2484_v59 = vadd.f32 %v2483_v58, %v2482_v57 }
 0x195   :  { %v2485_v7 = vpop.f32.mrb[36].mxu1 }
 0x196   :  { %v2486_v10 = vpop.f32.mrb[37].mxu1 }
 0x197   :  { %v2487_v19 = vadd.f32 %v2486_v10, %v2485_v7  ;;  %v2488_v60 = vpop.f32.mrb[38].mxu1 }
 0x198   :  { %v2489_v21 = vpop.f32.mrb[39].mxu1 }
 0x199   :  { %v2490_v30 = vadd.f32 %v2489_v21, %v2488_v60 }
 0x1ad   :  { %v2069_v34 = vpop.f32.mrb[40].mxu1 }
 0x1ae   :  { %v2070_v61 = vadd.f32 %v2463_v39, %v2069_v34  ;;  %v2071_v42 = vpop.f32.mrb[41].mxu1 }
 0x1af   :  { %v2072_v48 = vpop.f32.mrb[42].mxu1 }
 0x1b0   :  { %2115 = vst.msk [vmem:[#allocation2 + $0x30] sm:$0xff] %vm2114_vm1, %v2070_v61  ;;  %v2073_v55 = vadd.f32 %v2466_v41, %v2072_v48  ;;  %v2074_v62 = vpop.f32.mrb[43].mxu1 }
 0x1b2   :  { %2122 = vst.msk [vmem:[#allocation2 + $0x68] sm:$0xff] %vm2114_vm1, %v2073_v55 }
 0x1b5   :  { %v2077_v63 = vpop.f32.mrb[44].mxu1 }
 0x1b6   :  { %v2078_v0 = vadd.f32 %v2469_v45, %v2077_v63  ;;  %v2079_v47 = vpop.f32.mrb[45].mxu1 }
 0x1b7   :  { %v2080_v1 = vpop.f32.mrb[46].mxu1 }
 0x1b8   :  { %2129 = vst.msk [vmem:[#allocation2 + $0xa0] sm:$0xff] %vm2114_vm1, %v2078_v0  ;;  %v2081_v2 = vadd.f32 %v2472_v50, %v2080_v1  ;;  %v2082_v3 = vpop.f32.mrb[47].mxu1 }
 0x1ba   :  { %2136 = vst.msk [vmem:[#allocation2 + $0xd8] sm:$0xff] %vm2114_vm1, %v2081_v2 }
 0x1bd   :  { %v2085_v4 = vpop.f32.mrb[48].mxu1 }
 0x1be   :  { %v2086_v6 = vadd.f32 %v2475_v52, %v2085_v4  ;;  %v2087_v9 = vpop.f32.mrb[49].mxu1 }
 0x1bf   :  { %v2088_v11 = vpop.f32.mrb[50].mxu1 }
 0x1c0   :  { %2143 = vst.msk [vmem:[#allocation2 + $0x110] sm:$0xff] %vm2114_vm1, %v2086_v6  ;;  %v2089_v12 = vadd.f32 %v2478_v44, %v2088_v11  ;;  %v2090_v13 = vpop.f32.mrb[51].mxu1 }
 0x1c2   :  { %2150 = vst.msk [vmem:[#allocation2 + $0x148] sm:$0xff] %vm2114_vm1, %v2089_v12 }
 0x1c5   :  { %v2093_v14 = vpop.f32.mrb[52].mxu1  ;;  %v1913_v16 = vpop.f32.mrb[20].mxu0 }
 0x1c6   :  { %v2094_v17 = vadd.f32 %v2481_v49, %v2093_v14  ;;  %2112 = vst [vmem:[#allocation2 + $0x20] sm:$0xff] %v1913_v16  ;;  %v2095_v20 = vpop.f32.mrb[53].mxu1  ;;  %v1915_v22 = vpop.f32.mrb[21].mxu0 }
 0x1c7   :  { %2113 = vst [vmem:[#allocation2 + $0x28] sm:$0xff] %v1915_v22  ;;  %v2096_v23 = vpop.f32.mrb[54].mxu1  ;;  %v1917_v24 = vpop.f32.mrb[22].mxu0 }
 0x1c8   :  { %2157 = vst.msk [vmem:[#allocation2 + $0x180] sm:$0xff] %vm2114_vm1, %v2094_v17  ;;  %v2097_v26 = vadd.f32 %v2484_v59, %v2096_v23  ;;  %2120 = vst [vmem:[#allocation2 + $0x58] sm:$0xff] %v1917_v24  ;;  %v1919_v27 = vpop.f32.mrb[23].mxu0  ;;  %v2098_v29 = vpop.f32.mrb[55].mxu1 }
 0x1c9   :  { %2121 = vst [vmem:[#allocation2 + $0x60] sm:$0xff] %v1919_v27 }
 0x1ca   :  { %2164 = vst.msk [vmem:[#allocation2 + $0x1b8] sm:$0xff] %vm2114_vm1, %v2097_v26 }
 0x1cd   :  { %v2101_v31 = vpop.f32.mrb[56].mxu1  ;;  %v1923_v5 = vpop.f32.mrb[24].mxu0 }
 0x1ce   :  { %v2102_v32 = vadd.f32 %v2487_v19, %v2101_v31  ;;  %2127 = vst [vmem:[#allocation2 + $0x90] sm:$0xff] %v1923_v5  ;;  %v2103_v33 = vpop.f32.mrb[57].mxu1  ;;  %v1925_v8 = vpop.f32.mrb[25].mxu0 }
 0x1cf   :  { %2128 = vst [vmem:[#allocation2 + $0x98] sm:$0xff] %v1925_v8  ;;  %v2104_v36 = vpop.f32.mrb[58].mxu1  ;;  %v1927_v37 = vpop.f32.mrb[26].mxu0 }
 0x1d0   :  { %2171 = vst.msk [vmem:[#allocation2 + $0x1f0] sm:$0xff] %vm2114_vm1, %v2102_v32  ;;  %v2105_v15 = vadd.f32 %v2490_v30, %v2104_v36  ;;  %2134 = vst [vmem:[#allocation2 + $0xc8] sm:$0xff] %v1927_v37  ;;  %v1929_v39 = vpop.f32.mrb[27].mxu0  ;;  %v2106_v40 = vpop.f32.mrb[59].mxu1 }
 0x1d1   :  { %2135 = vst [vmem:[#allocation2 + $0xd0] sm:$0xff] %v1929_v39 }
 0x1d2   :  { %2178 = vst.msk [vmem:[#allocation2 + $0x228] sm:$0xff] %vm2114_vm1, %v2105_v15 }
 0x1d5   :  { %v1933_v18 = vpop.f32.mrb[28].mxu0 }
 0x1d6   :  { %2141 = vst [vmem:[#allocation2 + $0x100] sm:$0xff] %v1933_v18  ;;  %v1935_v41 = vpop.f32.mrb[29].mxu0 }
 0x1d7   :  { %2142 = vst [vmem:[#allocation2 + $0x108] sm:$0xff] %v1935_v41  ;;  %v1937_v43 = vpop.f32.mrb[30].mxu0 }
 0x1d8   :  { %2148 = vst [vmem:[#allocation2 + $0x138] sm:$0xff] %v1937_v43  ;;  %v1939_v25 = vpop.f32.mrb[31].mxu0 }
 0x1d9   :  { %2149 = vst [vmem:[#allocation2 + $0x140] sm:$0xff] %v1939_v25 }
 0x1dd   :  { %v1943_v45 = vpop.f32.mrb[32].mxu0 }
 0x1de   :  { %2155 = vst [vmem:[#allocation2 + $0x170] sm:$0xff] %v1943_v45  ;;  %v1945_v46 = vpop.f32.mrb[33].mxu0 }
 0x1df   :  { %2156 = vst [vmem:[#allocation2 + $0x178] sm:$0xff] %v1945_v46  ;;  %v1947_v28 = vpop.f32.mrb[34].mxu0 }
 0x1e0   :  { %2162 = vst [vmem:[#allocation2 + $0x1a8] sm:$0xff] %v1947_v28  ;;  %v1949_v50 = vpop.f32.mrb[35].mxu0 }
 0x1e1   :  { %2163 = vst [vmem:[#allocation2 + $0x1b0] sm:$0xff] %v1949_v50 }
 0x1e5   :  { %v1953_v51 = vpop.f32.mrb[36].mxu0 }
 0x1e6   :  { %2169 = vst [vmem:[#allocation2 + $0x1e0] sm:$0xff] %v1953_v51  ;;  %v1955_v35 = vpop.f32.mrb[37].mxu0 }
 0x1e7   :  { %2170 = vst [vmem:[#allocation2 + $0x1e8] sm:$0xff] %v1955_v35  ;;  %v1957_v52 = vpop.f32.mrb[38].mxu0 }
 0x1e8   :  { %2176 = vst [vmem:[#allocation2 + $0x218] sm:$0xff] %v1957_v52  ;;  %v1959_v38 = vpop.f32.mrb[39].mxu0 }
 0x1e9   :  { %2177 = vst [vmem:[#allocation2 + $0x220] sm:$0xff] %v1959_v38 }
 0x1ea   :  { %2896 = shalt.err (!%p2893_p4)
}
 0x1eb   :  { %s2897_s21 = scalar_lea.hbm %s3796_s2, 8960 }
 0x1ec   :  { %p2898_p5 = scmp.ne.s32.totalorder %s3796_s2, %s2897_s21  ;;  %p2901_p6 = scmp.lt.u32.totalorder %s2897_s21, %s3796_s2 }
 0x1ee   :  { %p2903_p7 = pnand %p2901_p6, %p2898_p5 }
 0x1f0   :  { %2906 = shalt.err (!%p2903_p7)
}
 0x1f1   :  { %s2911_s25 = smov 896   ;;  %s2912_s26 = smov 56  }
 0x1f2   :  { %2190 = dma.vmem_to_hbm [thread:$0]  %s2185_s17, 8960, %s3796_s2, [#allocation3], %s2911_s25, %s2911_s25, %s2912_s26  }
 0x1f3   :  { %2907 = dma.done.wait [#allocation3], 8960  }
 0x1f4   :  { %2908 = vsyncadd [#allocation3], 4294958336 }
 0x1f5   :  { %2194 = vsyncpa [#allocation3], 1 }

</bundles_post_ra>
